<compile_context>
chip_gen: v7x
topology: tpu7x:2x2x1
jax: 0.10.0
libtpu: 0.0.40
codegen_flags: <defaults>
</compile_context>

<pallas_src>
import jax
import jax.numpy as jnp
from jax.experimental import pallas as pl
from jax.experimental.pallas import tpu as pltpu


LANE = 128                    # TPU lane width: all layer output widths pad to this
SUBLANE = 8                   # batch-tile rows pad to a multiple of this
MIN_ROWS_FOR_TC_SPLIT = 512   # force >=2 parallel grid steps above this (v7x megacore)


def _round_up(n, m):
    return ((n + m - 1) // m) * m


def _cdiv(a, b):
    return -(-a // b)


# ------------------------------ kernel body ----------------------------------

def make_mlp_kernel(n_layers, out_pads):
    """Fused-MLP kernel: relu between layers, no relu after the last.
    Args: x_ref (bf16), w0..w{L-1} (bf16), bias_stack (f32), out_ref (bf16)."""

    def kernel(x_ref, *refs):
        out_ref = refs[-1]
        b_ref = refs[-2]
        w_refs = refs[:-2]
        b_all = b_ref[...]                       # f32 [n_layers, max_out_pad]
        x = x_ref[...]                           # bf16 [tb, in_dim]
        for li in range(n_layers):
            w = w_refs[li][...]                  # bf16 [in_pad, out_pad]
            op = out_pads[li]
            b = b_all[li:li + 1, :op]            # f32 [1, op]   (static slice)
            y = jnp.dot(x, w, preferred_element_type=jnp.float32) + b
            if li < n_layers - 1:
                # relu in f32 (safe on v5e), keep activation bf16 into next MXU pass
                x = jax.nn.relu(y).astype(jnp.bfloat16)
            else:
                out_ref[...] = y.astype(out_ref.dtype)   # lane-dense bf16 store

    return kernel


# --------------------------- parameter preparation ---------------------------

def _fused_dueling_head(wv, bv, wa, ba, num_action, atoms):
    """Fold `q = v + a - a.mean(action)` into one head matmul on [x_value | x_adv]."""
    na = num_action * atoms
    eye_a = jnp.eye(atoms, dtype=jnp.float32)
    tile_v = jnp.tile(eye_a, (1, num_action))                          # [atoms, na]
    mean_m = jnp.tile(eye_a, (num_action, num_action)) / num_action    # [na, na]
    adv_m = jnp.eye(na, dtype=jnp.float32) - mean_m
    w_head = jnp.concatenate([wv @ tile_v, wa @ adv_m], axis=0)        # [2h, na]
    b_head = bv.reshape(1, -1) @ tile_v + ba.reshape(1, -1) @ adv_m    # [1, na]
    return w_head, b_head


def prepare_params(params, *, num_layer, dueling, num_action, atoms):
    """Fuse dueling branches + combine into the MLP chain, zero-pad all output
    widths to multiples of 128, cast weights to bf16, stack biases (f32).
    Returns (weights_bf16, bias_stack_f32, out_pads, out_dim_real)."""

    def layer(w, b):
        return jnp.asarray(w, jnp.float32), jnp.asarray(b, jnp.float32).reshape(1, -1)

    layers = []
    if num_layer == 2:
        w1, b1, w2, b2, w3, b3 = params[:6]
        layers.append(layer(w1, b1))
        if dueling == 1:
            w2a, b2a, w3a, b3a = params[6:10]
            wh = jnp.concatenate([w2, w2a], axis=1)              # [h1, 2*h2]
            bh = jnp.concatenate([b2.reshape(1, -1), b2a.reshape(1, -1)], axis=1)
            layers.append((wh, bh))
            layers.append(_fused_dueling_head(w3, b3, w3a, b3a, num_action, atoms))
            out_real = num_action * atoms
        else:
            layers.append(layer(w2, b2))
            layers.append(layer(w3, b3))
            out_real = int(w3.shape[1])
    elif num_layer == 3:
        w1, b1, w2, b2, w3, b3, w4, b4 = params[:8]
        layers.append(layer(w1, b1))
        layers.append(layer(w2, b2))
        if dueling == 1:
            w3a, b3a, w4a, b4a = params[8:12]
            wh = jnp.concatenate([w3, w3a], axis=1)              # [h2, 2*h3]
            bh = jnp.concatenate([b3.reshape(1, -1), b3a.reshape(1, -1)], axis=1)
            layers.append((wh, bh))
            layers.append(_fused_dueling_head(w4, b4, w4a, b4a, num_action, atoms))
            out_real = num_action * atoms
        else:
            layers.append(layer(w3, b3))
            layers.append(layer(w4, b4))
            out_real = int(w4.shape[1])
    else:
        raise ValueError("num_layer must be 2 or 3")

    weights, biases, out_pads = [], [], []
    prev_out_pad = int(layers[0][0].shape[0])  # state_dim (input is not padded)
    for (w, b) in layers:
        in_dim, out_dim = int(w.shape[0]), int(w.shape[1])
        out_pad = _round_up(out_dim, LANE)
        w = jnp.pad(w, ((0, prev_out_pad - in_dim), (0, out_pad - out_dim)))
        b = jnp.pad(b.reshape(1, -1), ((0, 0), (0, out_pad - out_dim)))
        weights.append(w.astype(jnp.bfloat16))
        biases.append(b.astype(jnp.float32))
        out_pads.append(out_pad)
        prev_out_pad = out_pad

    max_pad = max(out_pads)
    b_stack = jnp.concatenate(
        [jnp.pad(b, ((0, 0), (0, max_pad - int(b.shape[1])))) for b in biases], axis=0)
    return weights, b_stack, out_pads, out_real


# ------------------------------ batch tiling ----------------------------------

def _batch_tiling(B, block_b):
    """Balanced batch tiling: minimal padding, >=2 even grid steps when B is large."""
    ntiles = max(1, _cdiv(B, block_b))
    if ntiles == 1 and B > MIN_ROWS_FOR_TC_SPLIT:
        ntiles = 2                                  # let v7x's 2nd TensorCore work
    if ntiles > 1 and ntiles % 2 == 1:
        ntiles += 1                                 # even split across 2 TCs
    tb = _round_up(_cdiv(B, ntiles), SUBLANE)
    bp = ntiles * tb
    return tb, bp, ntiles


# ------------------------------ forward wrapper -------------------------------

def critic_forward(state, params, *, num_layer, dueling, num_action, atoms,
                   block_b=1024):
    """Returns [B, num_action, atoms] if dueling else [B, num_action] (f32)."""
    weights, b_stack, out_pads, out_real = prepare_params(
        params, num_layer=num_layer, dueling=dueling,
        num_action=num_action, atoms=atoms)
    B, S = state.shape
    n_layers = len(weights)
    out_pad = out_pads[-1]

    tb, bp, ntiles = _batch_tiling(B, block_b)

    # bf16 input feeds the first MXU dot directly (half the input HBM bytes).
    x = state.astype(jnp.bfloat16)
    if bp != B:
        x = jnp.pad(x, ((0, bp - B), (0, 0)))

    in_specs = [pl.BlockSpec((tb, S), lambda i: (i, 0))]
    for w in weights:   # weights + bias stack: constant block -> VMEM-resident
        in_specs.append(pl.BlockSpec(w.shape, lambda i: (0, 0)))
    in_specs.append(pl.BlockSpec(b_stack.shape, lambda i: (0, 0)))
    out_spec = pl.BlockSpec((tb, out_pad), lambda i: (i, 0))

    flops = 2 * bp * sum(int(w.shape[0]) * int(w.shape[1]) for w in weights)
    bytes_accessed = int(x.size * 2
                         + sum(int(w.size) * 2 for w in weights)
                         + int(b_stack.size) * 4
                         + bp * out_pad * 2)

    out = pl.pallas_call(
        make_mlp_kernel(n_layers, tuple(out_pads)),
        out_shape=jax.ShapeDtypeStruct((bp, out_pad), jnp.bfloat16),
        grid_spec=pltpu.PrefetchScalarGridSpec(
            num_scalar_prefetch=0,
            grid=(ntiles,),
            in_specs=in_specs,
            out_specs=out_spec,
        ),
        compiler_params=pltpu.CompilerParams(
            dimension_semantics=("parallel",),
            vmem_limit_bytes=32 * 1024 * 1024,
        ),
        cost_estimate=pl.CostEstimate(flops=flops, transcendentals=0,
                                      bytes_accessed=bytes_accessed),
    )(x, *weights, b_stack)

    out = out[:B, :out_real].astype(jnp.float32)
    if dueling == 1:
        return out.reshape(B, num_action, atoms)
    return out


# --------------------------- parameter init ----------------------------------

def init_linear(key, in_dim, out_dim):
    """PyTorch-style nn.Linear init: U(-1/sqrt(fan_in), 1/sqrt(fan_in)).
    Weight stored transposed as [in, out]."""
    kw, kb = jax.random.split(key)
    bound = 1.0 / float(in_dim) ** 0.5
    w = jax.random.uniform(kw, (in_dim, out_dim), jnp.float32, -bound, bound)
    b = jax.random.uniform(kb, (1, out_dim), jnp.float32, -bound, bound)
    return w, b


def init_critic_params(key, state_dim, num_action, h1, h2, h3, num_layer, dueling, atoms):
    keys = jax.random.split(key, 8)
    params = []
    if num_layer == 2:
        params += list(init_linear(keys[0], state_dim, h1))
        params += list(init_linear(keys[1], h1, h2))
        out3 = atoms if dueling == 1 else num_action
        params += list(init_linear(keys[2], h2, out3))
        if dueling == 1:
            params += list(init_linear(keys[3], h1, h2))                  # fc2_adv
            params += list(init_linear(keys[4], h2, num_action * atoms))  # fc3_adv
    else:  # num_layer == 3
        params += list(init_linear(keys[0], state_dim, h1))
        params += list(init_linear(keys[1], h1, h2))
        params += list(init_linear(keys[2], h2, h3))
        out4 = atoms if dueling == 1 else num_action
        params += list(init_linear(keys[3], h3, out4))
        if dueling == 1:
            params += list(init_linear(keys[4], h2, h3))                  # fc3_adv
            params += list(init_linear(keys[5], h3, num_action * atoms))  # fc4_adv
    return params


# --------------------------- pure-JAX reference ------------------------------

def critic_reference(state, params, *, num_layer, dueling, num_action, atoms):
    """Faithful f32 re-implementation of the PyTorch forward."""
    def lin(x, w, b):
        return x @ w + b

    x = state
    if num_layer == 2:
        w1, b1, w2, b2, w3, b3 = params[:6]
        x1 = jax.nn.relu(lin(x, w1, b1))
        x2 = jax.nn.relu(lin(x1, w2, b2))
        if dueling == 1:
            w2a, b2a, w3a, b3a = params[6:10]
            x2a = jax.nn.relu(lin(x1, w2a, b2a))
            a = lin(x2a, w3a, b3a).reshape(-1, num_action, atoms)
            v = lin(x2, w3, b3).reshape(-1, 1, atoms)
            return v + a - a.mean(1, keepdims=True)
        return lin(x2, w3, b3)
    else:
        w1, b1, w2, b2, w3, b3, w4, b4 = params[:8]
        x1 = jax.nn.relu(lin(x, w1, b1))
        x2 = jax.nn.relu(lin(x1, w2, b2))
        x3 = jax.nn.relu(lin(x2, w3, b3))
        if dueling == 1:
            w3a, b3a, w4a, b4a = params[8:12]
            x3a = jax.nn.relu(lin(x2, w3a, b3a))
            a = lin(x3a, w4a, b4a).reshape(-1, num_action, atoms)
            v = lin(x3, w4, b4).reshape(-1, 1, atoms)
            return v + a - a.mean(1, keepdims=True)
        return lin(x3, w4, b4)


if __name__ == "__main__":
    key = jax.random.PRNGKey(0)
    k_state, k_p1, k_p2, k_p3, k_s3 = jax.random.split(key, 5)

    batch = 2
    state_dim = 32
    h1 = h2 = h3 = 64
    num_action = 4
    atoms = 8

    state = jax.random.normal(k_state, (batch, state_dim), jnp.float32)

    # bf16 weights/activations/input/output vs f32 reference -> bf16-level tolerance.
    ATOL = RTOL = 3e-2

    # Config 1: num_layer=2, dueling=1  -> output [batch, num_action, atoms]
    cfg1 = dict(num_layer=2, dueling=1, num_action=num_action, atoms=atoms)
    params1 = init_critic_params(k_p1, state_dim, num_action, h1, h2, h3,
                                 num_layer=2, dueling=1, atoms=atoms)
    q1 = jax.block_until_ready(critic_forward(state, params1, **cfg1))
    ref1 = critic_reference(state, params1, **cfg1)
    assert q1.shape == (batch, num_action, atoms)
    assert jnp.allclose(q1, ref1, atol=ATOL, rtol=RTOL), float(jnp.max(jnp.abs(q1 - ref1)))

    # Config 2: num_layer=3, dueling=0  -> output [batch, num_action]
    cfg2 = dict(num_layer=3, dueling=0, num_action=num_action, atoms=atoms)
    params2 = init_critic_params(k_p2, state_dim, num_action, h1, h2, h3,
                                 num_layer=3, dueling=0, atoms=atoms)
    q2 = jax.block_until_ready(critic_forward(state, params2, **cfg2))
    ref2 = critic_reference(state, params2, **cfg2)
    assert q2.shape == (batch, num_action)
    assert jnp.allclose(q2, ref2, atol=ATOL, rtol=RTOL), float(jnp.max(jnp.abs(q2 - ref2)))

    # Config 3: num_layer=3, dueling=1 with a non-divisible batch to exercise
    # balanced tiling (300 rows -> padded to 304, not 512).
    cfg3 = dict(num_layer=3, dueling=1, num_action=num_action, atoms=atoms)
    params3 = init_critic_params(k_p3, state_dim, num_action, h1, h2, h3,
                                 num_layer=3, dueling=1, atoms=atoms)
    state3 = jax.random.normal(k_s3, (300, state_dim), jnp.float32)
    q3 = jax.block_until_ready(critic_forward(state3, params3, **cfg3))
    ref3 = critic_reference(state3, params3, **cfg3)
    assert q3.shape == (300, num_action, atoms)
    assert jnp.allclose(q3, ref3, atol=ATOL, rtol=RTOL), float(jnp.max(jnp.abs(q3 - ref3)))

    # Config 4: large batch (1300 rows) -> 2 balanced parallel tiles of 656 rows,
    # exercising the megacore split path and the larger default block_b.
    state4 = jax.random.normal(k_s3, (1300, state_dim), jnp.float32)
    q4 = jax.block_until_ready(critic_forward(state4, params3, **cfg3))
    ref4 = critic_reference(state4, params3, **cfg3)
    assert q4.shape == (1300, num_action, atoms)
    assert jnp.allclose(q4, ref4, atol=ATOL, rtol=RTOL), float(jnp.max(jnp.abs(q4 - ref4)))

    print("KERNEL_OK")
</pallas_src>

<mosaic_0001>
module attributes {stable_mosaic.version = 11 : i64} {
  func.func @kernel(%arg0: i32, %arg1: memref<8x32xbf16, #tpu.memory_space<vmem>>, %arg2: memref<32x128xbf16, #tpu.memory_space<vmem>>, %arg3: memref<128x128xbf16, #tpu.memory_space<vmem>>, %arg4: memref<128x128xbf16, #tpu.memory_space<vmem>>, %arg5: memref<3x128xf32, #tpu.memory_space<vmem>>, %arg6: memref<8x128xbf16, #tpu.memory_space<vmem>>) attributes {dimension_semantics = [#tpu.dimension_semantics<parallel>], iteration_bounds = array<i64: 1>, scalar_prefetch = 0 : i64, scratch_operands = 0 : i64, tpu.core_type = #tpu.core_type<tc>, window_params = [{transform_indices = @transform_0, window_bounds = array<i64: 8, 32>}, {pipeline_mode = #tpu.pipeline_mode<synchronous>, transform_indices = @transform_1, window_bounds = array<i64: 32, 128>}, {pipeline_mode = #tpu.pipeline_mode<synchronous>, transform_indices = @transform_2, window_bounds = array<i64: 128, 128>}, {pipeline_mode = #tpu.pipeline_mode<synchronous>, transform_indices = @transform_3, window_bounds = array<i64: 128, 128>}, {pipeline_mode = #tpu.pipeline_mode<synchronous>, transform_indices = @transform_4, window_bounds = array<i64: 3, 128>}, {transform_indices = @transform_5, window_bounds = array<i64: 8, 128>}]} {
    %c0 = arith.constant 0 : index
    %c0_0 = arith.constant 0 : index
    %0 = vector.load %arg5[%c0, %c0_0] : memref<3x128xf32, #tpu.memory_space<vmem>>, vector<3x128xf32>
    %c0_1 = arith.constant 0 : index
    %c0_2 = arith.constant 0 : index
    %1 = vector.load %arg1[%c0_1, %c0_2] : memref<8x32xbf16, #tpu.memory_space<vmem>>, vector<8x32xbf16>
    %c0_3 = arith.constant 0 : index
    %c0_4 = arith.constant 0 : index
    %2 = vector.load %arg2[%c0_3, %c0_4] : memref<32x128xbf16, #tpu.memory_space<vmem>>, vector<32x128xbf16>
    %3 = vector.extract_strided_slice %0 {offsets = [0, 0], sizes = [1, 128], strides = [1, 1]} : vector<3x128xf32> to vector<1x128xf32>
    %cst = arith.constant dense<0.000000e+00> : vector<8x128xf32>
    %4 = tpu.matmul %1, %2, %cst {dimension_numbers = #tpu.dot_dimension_numbers<[1], [0], [0], [1], [0, 0, 1, 1], [], []>} : vector<8x32xbf16>, vector<32x128xbf16>, vector<8x128xf32> -> vector<8x128xf32>
    %5 = vector.broadcast %3 : vector<1x128xf32> to vector<8x128xf32>
    %6 = arith.addf %4, %5 : vector<8x128xf32>
    %cst_5 = arith.constant 0.000000e+00 : f32
    %7 = vector.broadcast %cst_5 : f32 to vector<8x128xf32>
    %8 = arith.maximumf %6, %7 : vector<8x128xf32>
    %9 = arith.truncf %8 : vector<8x128xf32> to vector<8x128xbf16>
    %c0_6 = arith.constant 0 : index
    %c0_7 = arith.constant 0 : index
    %10 = vector.load %arg3[%c0_6, %c0_7] : memref<128x128xbf16, #tpu.memory_space<vmem>>, vector<128x128xbf16>
    %11 = vector.extract_strided_slice %0 {offsets = [1, 0], sizes = [1, 128], strides = [1, 1]} : vector<3x128xf32> to vector<1x128xf32>
    %cst_8 = arith.constant dense<0.000000e+00> : vector<8x128xf32>
    %12 = tpu.matmul %9, %10, %cst_8 {dimension_numbers = #tpu.dot_dimension_numbers<[1], [0], [0], [1], [0, 0, 1, 1], [], []>} : vector<8x128xbf16>, vector<128x128xbf16>, vector<8x128xf32> -> vector<8x128xf32>
    %13 = vector.broadcast %11 : vector<1x128xf32> to vector<8x128xf32>
    %14 = arith.addf %12, %13 : vector<8x128xf32>
    %cst_9 = arith.constant 0.000000e+00 : f32
    %15 = vector.broadcast %cst_9 : f32 to vector<8x128xf32>
    %16 = arith.maximumf %14, %15 : vector<8x128xf32>
    %17 = arith.truncf %16 : vector<8x128xf32> to vector<8x128xbf16>
    %c0_10 = arith.constant 0 : index
    %c0_11 = arith.constant 0 : index
    %18 = vector.load %arg4[%c0_10, %c0_11] : memref<128x128xbf16, #tpu.memory_space<vmem>>, vector<128x128xbf16>
    %19 = vector.extract_strided_slice %0 {offsets = [2, 0], sizes = [1, 128], strides = [1, 1]} : vector<3x128xf32> to vector<1x128xf32>
    %cst_12 = arith.constant dense<0.000000e+00> : vector<8x128xf32>
    %20 = tpu.matmul %17, %18, %cst_12 {dimension_numbers = #tpu.dot_dimension_numbers<[1], [0], [0], [1], [0, 0, 1, 1], [], []>} : vector<8x128xbf16>, vector<128x128xbf16>, vector<8x128xf32> -> vector<8x128xf32>
    %21 = vector.broadcast %19 : vector<1x128xf32> to vector<8x128xf32>
    %22 = arith.addf %20, %21 : vector<8x128xf32>
    %23 = arith.truncf %22 : vector<8x128xf32> to vector<8x128xbf16>
    %c0_13 = arith.constant 0 : index
    %c0_14 = arith.constant 0 : index
    %24 = vector.load %arg6[%c0_13, %c0_14] : memref<8x128xbf16, #tpu.memory_space<vmem>>, vector<8x128xbf16>
    tpu.vector_store %arg6[%c0_13, %c0_14], %23 {strides = array<i32>} : memref<8x128xbf16, #tpu.memory_space<vmem>>, vector<8x128xbf16>,
    return
  }
  func.func @transform_0(%arg0: i32) -> (i32, i32) {
    %c0_i32 = arith.constant 0 : i32
    %c0_i32_0 = arith.constant 0 : i32
    return %arg0, %c0_i32 : i32, i32
  }
  func.func @transform_1(%arg0: i32) -> (i32, i32) {
    %c0_i32 = arith.constant 0 : i32
    %c0_i32_0 = arith.constant 0 : i32
    %c0_i32_1 = arith.constant 0 : i32
    return %c0_i32, %c0_i32_0 : i32, i32
  }
  func.func @transform_2(%arg0: i32) -> (i32, i32) {
    %c0_i32 = arith.constant 0 : i32
    %c0_i32_0 = arith.constant 0 : i32
    %c0_i32_1 = arith.constant 0 : i32
    return %c0_i32, %c0_i32_0 : i32, i32
  }
  func.func @transform_3(%arg0: i32) -> (i32, i32) {
    %c0_i32 = arith.constant 0 : i32
    %c0_i32_0 = arith.constant 0 : i32
    %c0_i32_1 = arith.constant 0 : i32
    return %c0_i32, %c0_i32_0 : i32, i32
  }
  func.func @transform_4(%arg0: i32) -> (i32, i32) {
    %c0_i32 = arith.constant 0 : i32
    %c0_i32_0 = arith.constant 0 : i32
    %c0_i32_1 = arith.constant 0 : i32
    return %c0_i32, %c0_i32_0 : i32, i32
  }
  func.func @transform_5(%arg0: i32) -> (i32, i32) {
    %c0_i32 = arith.constant 0 : i32
    %c0_i32_0 = arith.constant 0 : i32
    return %arg0, %c0_i32 : i32, i32
  }
}

</mosaic_0001>

<bundles_post_ra>
// kernel: tpu_custom_call.1
= control target key start
LH: loop header
LB: loop body
LE: loop exit
PB: predicated region body
PF: predicated region fallthrough
CT: control target
= control target key end

     0   :  { %10 = vsyncpa [#allocation3], 0  ;;  %s748_s0 = inlined_call_operand.hbm [shape: bf16[8,32], index: 0, kind: input, shape index: {}]   ;;  %s749_s1 = inlined_call_operand.hbm [shape: bf16[32,128], index: 1, kind: input, shape index: {}]   ;;  %s750_s2 = inlined_call_operand.hbm [shape: bf16[128,128], index: 2, kind: input, shape index: {}]   ;;  %s751_s3 = inlined_call_operand.hbm [shape: bf16[128,128], index: 3, kind: input, shape index: {}]   ;;  %s752_s4 = inlined_call_operand.vmem [shape: f32[3,128], index: 4, kind: input, shape index: {}]   ;;  %s753_s5 = inlined_call_operand.hbm [shape: bf16[8,128], index: 5, kind: output, shape index: {}]  }
   0x1   :  { %11 = vsyncpa [#allocation6], 0 }
   0x2   :  { %12 = vsyncpa [#allocation9], 0 }
   0x3   :  { %13 = vsyncpa [#allocation4], 0  ;;  %s613_s18 = smov [#allocation5]   ;;  %s495_s22 = scalar_lea.hbm %s749_s1, 256 }
   0x4   :  { %s29_s19 = sshll.u32 %s613_s18, 4  ;;  %p496_p0 = scmp.ne.s32.totalorder %s749_s1, %s495_s22  ;;  %s30_s19 = int_to_ptr.vmem [resolvable:$true] %s29_s19 }
   0x5   :  { %p499_p1 = scmp.lt.u32.totalorder %s495_s22, %s749_s1 }
   0x7   :  { %p501_p2 = pnand %p499_p1, %p496_p0 }
   0x9   :  { %504 = shalt.err (!%p501_p2)
}
   0xa   :  { %s505_s27 = scalar_lea.vmem %s30_s19, 256  ;;  %p510_p4 = scmp.lt.s32.totalorder %s30_s19, %s30_s19 }
   0xb   :  { %p506_p3 = scmp.ne.s32.totalorder %s30_s19, %s505_s27  ;;  %p511_p5 = scmp.lt.s32.totalorder %s505_s27, %s505_s27 }
   0xd   :  { %p512_p6 = por %p511_p5, %p510_p4 }
   0xf   :  { %p513_p7 = pnand %p512_p6, %p506_p3 }
  0x11   :  { %516 = shalt.err (!%p513_p7)
}
  0x12   :  { %s614_s28 = smov 64   ;;  %s615_s29 = smov 4  }
  0x13   :  { %35 = dma.hbm_to_vmem [thread:$0]  %s749_s1, 256, %s30_s19, [#allocation6], %s614_s28, %s614_s28, %s615_s29  }
  0x14   :  { %s616_s7 = smov [#allocation2]   ;;  %s617_s9 = smov [#allocation7]  }
  0x15   :  { %s20_s8 = sshll.u32 %s616_s7, 4  ;;  %s41_s10 = sshll.u32 %s617_s9, 4  ;;  %s21_s8 = int_to_ptr.vmem [resolvable:$true] %s20_s8  ;;  %s42_s10 = int_to_ptr.vmem [resolvable:$true] %s41_s10 }
  0x16   :  { %s517_s13 = scalar_lea.hbm %s748_s0, 64 }
  0x17   :  { %p518_p8 = scmp.ne.s32.totalorder %s748_s0, %s517_s13  ;;  %p521_p9 = scmp.lt.u32.totalorder %s517_s13, %s748_s0 }
  0x19   :  { %p523_p10 = pnand %p521_p9, %p518_p8 }
  0x1b   :  { %526 = shalt.err (!%p523_p10)
}
  0x1c   :  { %s527_s1 = scalar_lea.vmem %s21_s8, 64  ;;  %p532_p12 = scmp.lt.s32.totalorder %s21_s8, %s21_s8 }
  0x1d   :  { %p528_p11 = scmp.ne.s32.totalorder %s21_s8, %s527_s1  ;;  %p533_p13 = scmp.lt.s32.totalorder %s527_s1, %s527_s1 }
  0x1f   :  { %p534_p0 = por %p533_p13, %p532_p12 }
  0x21   :  { %p535_p1 = pnand %p534_p0, %p528_p11 }
  0x23   :  { %538 = shalt.err (!%p535_p1)
}
  0x24   :  { %23 = dma.hbm_to_vmem [thread:$0]  %s748_s0, 64, %s21_s8, [#allocation3]  }
  0x25   :  { %s539_s22 = scalar_lea.hbm %s750_s2, 1024 }
  0x26   :  { %p540_p2 = scmp.ne.s32.totalorder %s750_s2, %s539_s22  ;;  %p543_p3 = scmp.lt.u32.totalorder %s539_s22, %s750_s2 }
  0x28   :  { %p545_p4 = pnand %p543_p3, %p540_p2 }
  0x2a   :  { %548 = shalt.err (!%p545_p4)
}
  0x2b   :  { %s549_s27 = scalar_lea.vmem %s42_s10, 1024  ;;  %p554_p6 = scmp.lt.s32.totalorder %s42_s10, %s42_s10 }
  0x2c   :  { %p550_p5 = scmp.ne.s32.totalorder %s42_s10, %s549_s27  ;;  %p555_p7 = scmp.lt.s32.totalorder %s549_s27, %s549_s27 }
  0x2e   :  { %p556_p8 = por %p555_p7, %p554_p6 }
  0x30   :  { %p557_p9 = pnand %p556_p8, %p550_p5 }
  0x32   :  { %560 = shalt.err (!%p557_p9)
}
  0x33   :  { %47 = dma.hbm_to_vmem [thread:$0]  %s750_s2, 1024, %s42_s10, [#allocation6], %s614_s28, %s614_s28, %s615_s29  }
  0x34   :  { %s618_s6 = smov [#allocation8]   ;;  %s561_s11 = scalar_lea.hbm %s751_s3, 1024 }
  0x35   :  { %s53_s7 = sshll.u32 %s618_s6, 4  ;;  %p562_p10 = scmp.ne.s32.totalorder %s751_s3, %s561_s11  ;;  %s54_s7 = int_to_ptr.vmem [resolvable:$true] %s53_s7 }
  0x36   :  { %p565_p11 = scmp.lt.u32.totalorder %s561_s11, %s751_s3 }
  0x38   :  { %p567_p12 = pnand %p565_p11, %p562_p10 }
  0x3a   :  { %570 = shalt.err (!%p567_p12)
}
  0x3b   :  { %s571_s16 = scalar_lea.vmem %s54_s7, 1024  ;;  %p576_p0 = scmp.lt.s32.totalorder %s54_s7, %s54_s7 }
  0x3c   :  { %p572_p13 = scmp.ne.s32.totalorder %s54_s7, %s571_s16  ;;  %p577_p1 = scmp.lt.s32.totalorder %s571_s16, %s571_s16 }
  0x3e   :  { %p578_p2 = por %p577_p1, %p576_p0 }
  0x40   :  { %p579_p3 = pnand %p578_p2, %p572_p13 }
  0x42   :  { %582 = shalt.err (!%p579_p3)
}
  0x43   :  { %59 = dma.hbm_to_vmem [thread:$0]  %s751_s3, 1024, %s54_s7, [#allocation9], %s614_s28, %s614_s28, %s615_s29  }
  0x44   :  { %605 = dma.done.wait [#allocation3], 64  }
  0x45   :  { %606 = vsyncadd [#allocation3], 4294967232 }
  0x46   :  { %607 = dma.done.wait [#allocation6], 1280  }
  0x47   :  { %608 = vsyncadd [#allocation6], 4294966016 }
  0x48   :  { %609 = dma.done.wait [#allocation9], 1024  }
  0x49   :  { %610 = vsyncadd [#allocation9], 4294966272  ;;  %v619_v0 = vmov 0.0   ;;  %vm620_vm0 = vmmov 0   ;;  %v477_v1 = vld [vmem:[#allocation5] sm:$0xff]   ;;  %v478_v2 = vld [vmem:[#allocation5 + $0x8] sm:$0xff]   ;;  %v81_v18 = vlaneseq }
  0x4a   :  { %420 = vmatprep.subr.bf16.mxu0 %v619_v0  ;;  %424 = vmatprep.mubr.msk.bf16.mxu0 %vm620_vm0, %v619_v0  ;;  %v479_v3 = vld [vmem:[#allocation7] sm:$0xff]   ;;  %vm97_vm1 = vcmask 261120   ;;  %v480_v4 = vld [vmem:[#allocation7 + $0x8] sm:$0xff]   ;;  %v481_v6 = vld [vmem:[#allocation7 + $0x10] sm:$0xff]  }
  0x4b   :  { %428 = vmatprep.subr.bf16.mxu1 %v619_v0  ;;  %444 = vmatprep.mubr.msk.bf16.mxu1 %vm620_vm0, %v619_v0  ;;  %v76_v5 = vld [vmem:[#allocation2] sm:$0xf]  ;;  %v482_v7 = vld [vmem:[#allocation7 + $0x18] sm:$0xff]   ;;  %v483_v8 = vld [vmem:[#allocation7 + $0x20] sm:$0xff]   ;;  %v82_v19 = vshrl.u32 %v81_v18, 7 }
  0x4c   :  { %421 = vmatpush3.bf16.msra.mxu0 %v477_v1  ;;  %429 = vmatpush3.bf16.msra.mxu1 %v479_v3  ;;  %v484_v9 = vld [vmem:[#allocation7 + $0x28] sm:$0xff]   ;;  %v485_v10 = vld [vmem:[#allocation7 + $0x30] sm:$0xff]   ;;  %v486_v11 = vld [vmem:[#allocation7 + $0x38] sm:$0xff]  }
  0x4d   :  { %422 = vmatprep.subr.bf16.mxu0 %v619_v0  ;;  %430 = vmatprep.subr.bf16.mxu1 %v619_v0  ;;  %v487_v12 = vld [vmem:[#allocation8] sm:$0xff]   ;;  %v488_v13 = vld [vmem:[#allocation8 + $0x8] sm:$0xff]   ;;  %v489_v14 = vld [vmem:[#allocation8 + $0x10] sm:$0xff]   ;;  %v83_v20 = vsub.s32 0, %v82_v19  ;;  %v161_v32 = vsub.s32 1, %v82_v19  ;;  %v271_v41 = vsub.s32 2, %v82_v19 }
  0x4e   :  { %v490_v15 = vld [vmem:[#allocation8 + $0x18] sm:$0xff]   ;;  %v491_v16 = vld [vmem:[#allocation8 + $0x20] sm:$0xff]   ;;  %v492_v17 = vld [vmem:[#allocation8 + $0x28] sm:$0xff]  }
  0x4f   :  { %v75_v21 = vld [vmem:[%s752_s4] sm:$0x7]  ;;  %v493_v30 = vld [vmem:[#allocation8 + $0x30] sm:$0xff]   ;;  %v494_v31 = vld [vmem:[#allocation8 + $0x38] sm:$0xff]   ;;  %s621_s4 = smov [#allocation10]  }
  0x50   :  { %423 = vmatpush3.bf16.msra.mxu0 %v478_v2  ;;  %431 = vmatpush3.bf16.msra.mxu1 %v480_v4  ;;  %v84_v22 = vrot.slane %v75_v21, %v83_v20  ;;  %v162_v33 = vrot.slane %v75_v21, %v161_v32  ;;  %v272_v42 = vrot.slane %v75_v21, %v271_v41  ;;  %s369_s29 = sshll.u32 %s621_s4, 4  ;;  %s370_s29 = int_to_ptr.vmem [resolvable:$true] %s369_s29 }
  0x51   :  { %448 = vmatprep.subr.bf16.mxu0 %v619_v0  ;;  %432 = vmatprep.subr.bf16.mxu1 %v619_v0  ;;  %s583_s17 = scalar_lea.vmem %s370_s29, 64  ;;  %p588_p5 = scmp.lt.s32.totalorder %s370_s29, %s370_s29 }
  0x52   :  { %p584_p4 = scmp.ne.s32.totalorder %s370_s29, %s583_s17  ;;  %p589_p6 = scmp.lt.s32.totalorder %s583_s17, %s583_s17 }
  0x53   :  { %425 = vmatmul.mubr.msk.bf16.vlgmr.msra.gmra.mrb[0].mxu0 %vm97_vm1, %v76_v5 }
  0x54   :  { %464 = vmatprep.mubr.msk.bf16.mxu0 %vm620_vm0, %v619_v0  ;;  %433 = vmatpush3.bf16.msra.mxu1 %v481_v6  ;;  %p590_p7 = por %p589_p6, %p588_p5 }
  0x55   :  { %434 = vmatprep.subr.bf16.mxu1 %v619_v0  ;;  %449 = vmatpush3.bf16.msra.mxu0 %v487_v12 }
  0x56   :  { %450 = vmatprep.subr.bf16.mxu0 %v619_v0  ;;  %p591_p8 = pnand %p590_p7, %p584_p4 }
  0x58   :  { %435 = vmatpush3.bf16.msra.mxu1 %v482_v7 }
  0x59   :  { %436 = vmatprep.subr.bf16.mxu1 %v619_v0  ;;  %451 = vmatpush3.bf16.msra.mxu0 %v488_v13 }
  0x5a   :  { %452 = vmatprep.subr.bf16.mxu0 %v619_v0 }
  0x5c   :  { %437 = vmatpush3.bf16.msra.mxu1 %v483_v8 }
  0x5d   :  { %438 = vmatprep.subr.bf16.mxu1 %v619_v0  ;;  %453 = vmatpush3.bf16.msra.mxu0 %v489_v14 }
  0x5e   :  { %454 = vmatprep.subr.bf16.mxu0 %v619_v0 }
  0x60   :  { %439 = vmatpush3.bf16.msra.mxu1 %v484_v9 }
  0x61   :  { %440 = vmatprep.subr.bf16.mxu1 %v619_v0  ;;  %455 = vmatpush3.bf16.msra.mxu0 %v490_v15 }
  0x62   :  { %456 = vmatprep.subr.bf16.mxu0 %v619_v0 }
  0x64   :  { %441 = vmatpush3.bf16.msra.mxu1 %v485_v10 }
  0x65   :  { %442 = vmatprep.subr.bf16.mxu1 %v619_v0  ;;  %457 = vmatpush3.bf16.msra.mxu0 %v491_v16 }
  0x66   :  { %458 = vmatprep.subr.bf16.mxu0 %v619_v0 }
  0x68   :  { %443 = vmatpush3.bf16.msra.mxu1 %v486_v11 }
  0x69   :  { %459 = vmatpush3.bf16.msra.mxu0 %v492_v17 }
  0x6a   :  { %460 = vmatprep.subr.bf16.mxu0 %v619_v0 }
  0x6d   :  { %461 = vmatpush3.bf16.msra.mxu0 %v493_v30 }
  0x6e   :  { %462 = vmatprep.subr.bf16.mxu0 %v619_v0 }
  0x71   :  { %463 = vmatpush3.bf16.msra.mxu0 %v494_v31 }
 0x126   :  { %v135_v23 = vpop.f32.mrb[0].mxu0 }
 0x127   :  { %v136_v24 = vadd.f32 %v135_v23, %v84_v22  ;;  %v426_v25 = vpop.f32.mrb[1].mxu0 }
 0x128   :  { %v138_v26 = vpop.f32.mrb[2].mxu0 }
 0x129   :  { %v141_v27 = vmax.f32 %v136_v24, 0.0  ;;  %v427_v28 = vpop.f32.mrb[3].mxu0 }
 0x12b   :  { %v142_v29 = vpack.c.bf16 %v141_v27, %v141_v27 }
 0x12d   :  { %445 = vmatmul.mubr.bf16.vlgmr.msra.gmra.mrb[0].mxu1 %v142_v29 }
 0x200   :  { %v245_v34 = vpop.f32.mrb[0].mxu1 }
 0x201   :  { %v246_v35 = vadd.f32 %v245_v34, %v162_v33  ;;  %v446_v36 = vpop.f32.mrb[1].mxu1 }
 0x202   :  { %v248_v37 = vpop.f32.mrb[2].mxu1 }
 0x203   :  { %v251_v38 = vmax.f32 %v246_v35, 0.0  ;;  %v447_v39 = vpop.f32.mrb[3].mxu1 }
 0x205   :  { %v252_v40 = vpack.c.bf16 %v251_v38, %v251_v38 }
 0x207   :  { %465 = vmatmul.mubr.bf16.vlgmr.msra.gmra.mrb[4].mxu0 %v252_v40 }
 0x2da   :  { %v355_v43 = vpop.f32.mrb[4].mxu0 }
 0x2db   :  { %v356_v44 = vadd.f32 %v355_v43, %v272_v42  ;;  %v466_v45 = vpop.f32.mrb[5].mxu0 }
 0x2dc   :  { %v358_v46 = vpop.f32.mrb[6].mxu0 }
 0x2dd   :  { %v361_v47 = vpack.c.bf16 %v356_v44, %v356_v44  ;;  %v467_v48 = vpop.f32.mrb[7].mxu0 }
 0x2df   :  { %362 = vst [vmem:[#allocation10] sm:$0xf] %v361_v47 }
 0x2e0   :  { %594 = shalt.err (!%p591_p8)
}
 0x2e1   :  { %s595_s19 = scalar_lea.hbm %s753_s5, 64 }
 0x2e2   :  { %p596_p9 = scmp.ne.s32.totalorder %s753_s5, %s595_s19  ;;  %p599_p10 = scmp.lt.u32.totalorder %s595_s19, %s753_s5 }
 0x2e4   :  { %p601_p11 = pnand %p599_p10, %p596_p9 }
 0x2e6   :  { %604 = shalt.err (!%p601_p11)
}
 0x2e7   :  { %372 = dma.vmem_to_hbm [thread:$0]  %s370_s29, 64, %s753_s5, [#allocation4]  }
 0x2e8   :  { %611 = dma.done.wait [#allocation4], 64  }
 0x2e9   :  { %612 = vsyncadd [#allocation4], 4294967232 }
 0x2ea   :  { %376 = vsyncpa [#allocation3], 1 }
 0x2eb   :  { %377 = vsyncpa [#allocation6], 1 }
 0x2ec   :  { %378 = vsyncpa [#allocation9], 1 }
 0x2ed   :  { %379 = vsyncpa [#allocation4], 1 }

</bundles_post_ra>
